<compile_context>
chip_gen: v6e
topology: v6e:2x2x1
jax: 0.10.0
libtpu: 0.0.40
codegen_flags: <defaults>
</compile_context>

<pallas_src>
import jax
import jax.numpy as jnp
from jax.experimental import pallas as pl
from jax.experimental.pallas import tpu as pltpu


def lstm_linear_kernel(gx_ref, whh_ref, wlin_ref, blin_ref, out_ref):
    """gx_ref  : (T, B, 4H) precomputed x@W_ih^T + (b_ih+b_hh); gate order (i, f, o, g); the
                 sigmoid-gate (i,f,o) columns are pre-scaled by 0.5 (tanh-based sigmoid).
       whh_ref : (H, 4H)    W_hh^T, same gate order / pre-scaling.
       wlin_ref: (T, 1, H)  output Linear weight regrouped per timestep (O == 1 path).
       blin_ref: (1, 1)     output Linear bias.
       out_ref : (B, 1)."""
    T, B, _ = gx_ref.shape
    H = whh_ref.shape[0]

    h = jnp.zeros((B, H), jnp.float32)
    c = jnp.zeros((B, H), jnp.float32)
    acc = jnp.zeros((B, H), jnp.float32)          # per-lane partial sums of the O=1 Linear

    # T is small and static -> unrolled Python loop (full LLO scheduler visibility).
    for t in range(T):
        # (B,H) @ (H,4H): tiny constant RHS streamed straight from VMEM each step (no hoist).
        gates = gx_ref[t] + jnp.dot(h, whh_ref[...], preferred_element_type=jnp.float32)
        th = jnp.tanh(gates)                      # ONE EUP pass covers all four gates
        i_g = 0.5 * th[:, 0 * H:1 * H] + 0.5      # sigmoid(x) = 0.5*tanh(0.5*x)+0.5 (pre-scaled)
        f_g = 0.5 * th[:, 1 * H:2 * H] + 0.5
        o_g = 0.5 * th[:, 2 * H:3 * H] + 0.5
        g_g = th[:, 3 * H:4 * H]                  # candidate gate: plain tanh
        c = f_g * c + i_g * g_g
        h = o_g * jnp.tanh(c)                     # second (H-lane) EUP pass
        acc = acc + h * wlin_ref[t]               # fused O=1 Linear: VPU mul-add, no hs scratch

    # One cross-lane reduce instead of a lane-padded (T*Hp, 1) MXU matmul.
    out_ref[...] = jnp.sum(acc, axis=-1, keepdims=True) + blin_ref[...]


def prepare_params(w_ih, w_hh, b_ih, b_hh, w_lin, b_lin, seq_len):
    """Init-time weight repack (runs once, outside the jitted per-call path).
       PyTorch-shaped params: w_ih (4H, I), w_hh (4H, H), b_* (4H,), w_lin (O, T*H), b_lin (O,)."""
    H = w_hh.shape[1]
    O = w_lin.shape[0]
    T = seq_len
    assert O == 1, "TODO(synk): O>1 needs an hs scratch + MXU epilogue"
    GATE_ORDER = (0, 1, 3, 2)                     # PyTorch (i, f, g, o) -> (i, f, o, g)

    def repack(w):                                # (rows, 4H) -> reordered + sigmoid-gates*0.5
        blocks = []
        for j, g in enumerate(GATE_ORDER):
            scale = 0.5 if j < 3 else 1.0         # 0.5 for sigmoid gates (i,f,o), 1.0 for tanh g
            blocks.append(scale * w[:, g * H:(g + 1) * H])
        return jnp.concatenate(blocks, axis=1)

    wih_p = repack(w_ih.T.astype(jnp.float32))                                   # (I, 4H)
    whh_p = repack(w_hh.T.astype(jnp.float32))                                   # (H, 4H)
    b_p = repack((b_ih + b_hh).astype(jnp.float32).reshape(1, 4 * H)).reshape(4 * H)
    wlin_p = w_lin.astype(jnp.float32).reshape(T, H)[:, None, :]                 # (T, 1, H)
    blin_p = b_lin.astype(jnp.float32).reshape(1, 1)                             # (1, 1)
    return wih_p, whh_p, b_p, wlin_p, blin_p


@jax.jit
def lstm_forward(x, wih_p, whh_p, b_p, wlin_p, blin_p):
    """x: (B, T, I); params from prepare_params. Zero initial (h0, c0) as in the module."""
    x = x.astype(jnp.float32)
    B = x.shape[0]
    # Input projection (+ both biases) hoisted out of the recurrence: time-major, lane-dense.
    gx = jnp.einsum('bti,ik->tbk', x, wih_p) + b_p                               # (T, B, 4H)

    vmem = pl.BlockSpec(memory_space=pltpu.MemorySpace.VMEM)
    return pl.pallas_call(
        lstm_linear_kernel,
        out_shape=jax.ShapeDtypeStruct((B, blin_p.shape[-1]), jnp.float32),
        in_specs=[vmem] * 4,
        out_specs=vmem,
    )(gx, whh_p, wlin_p, blin_p)


def lstm_forward_ref(x, w_ih, w_hh, b_ih, b_hh, w_lin, b_lin):
    """Pure-JAX reference matching torch.nn.LSTM(batch_first=True) + Linear."""
    B, T, I = x.shape
    H = w_hh.shape[1]
    h = jnp.zeros((B, H), jnp.float32)
    c = jnp.zeros((B, H), jnp.float32)
    outs = []
    for t in range(T):
        gates = x[:, t, :] @ w_ih.T + b_ih + h @ w_hh.T + b_hh
        i_g = jax.nn.sigmoid(gates[:, 0 * H:1 * H])
        f_g = jax.nn.sigmoid(gates[:, 1 * H:2 * H])
        g_g = jnp.tanh(gates[:, 2 * H:3 * H])
        o_g = jax.nn.sigmoid(gates[:, 3 * H:4 * H])
        c = f_g * c + i_g * g_g
        h = o_g * jnp.tanh(c)
        outs.append(h)
    lstm_out = jnp.stack(outs, axis=1).reshape(B, T * H)
    return lstm_out @ w_lin.T + b_lin


if __name__ == "__main__":
    # Small shapes consistent with the module (input_size, hidden, seq_len, output_size).
    B, T, I, H, O = 2, 8, 4, 32, 1

    key = jax.random.PRNGKey(0)
    ks = jax.random.split(key, 7)
    scale = 0.1
    x = jax.random.normal(ks[0], (B, T, I), jnp.float32)
    w_ih = scale * jax.random.normal(ks[1], (4 * H, I), jnp.float32)
    w_hh = scale * jax.random.normal(ks[2], (4 * H, H), jnp.float32)
    b_ih = scale * jax.random.normal(ks[3], (4 * H,), jnp.float32)
    b_hh = scale * jax.random.normal(ks[4], (4 * H,), jnp.float32)
    w_lin = scale * jax.random.normal(ks[5], (O, T * H), jnp.float32)
    b_lin = scale * jax.random.normal(ks[6], (O,), jnp.float32)

    params = prepare_params(w_ih, w_hh, b_ih, b_hh, w_lin, b_lin, seq_len=T)
    out = lstm_forward(x, *params)
    out = jax.block_until_ready(out)

    ref = lstm_forward_ref(x, w_ih, w_hh, b_ih, b_hh, w_lin, b_lin)
    assert out.shape == (B, O)
    assert jnp.allclose(out, ref, atol=1e-5, rtol=1e-5), (out, ref)
    print("KERNEL_OK")
</pallas_src>

<mosaic_0001>
module attributes {stable_mosaic.version = 11 : i64} {
  func.func @lstm_linear_kernel(%arg0: memref<8x2x128xf32, #tpu.memory_space<vmem>>, %arg1: memref<32x128xf32, #tpu.memory_space<vmem>>, %arg2: memref<8x1x32xf32, #tpu.memory_space<vmem>>, %arg3: memref<1x1xf32, #tpu.memory_space<vmem>>, %arg4: memref<2x1xf32, #tpu.memory_space<vmem>>) attributes {dimension_semantics = [], scalar_prefetch = 0 : i64, scratch_operands = 0 : i64, tpu.core_type = #tpu.core_type<tc>} {
    %cst = arith.constant 0.000000e+00 : f32
    %0 = vector.broadcast %cst : f32 to vector<2x32xf32>
    %cst_0 = arith.constant 0.000000e+00 : f32
    %1 = vector.broadcast %cst_0 : f32 to vector<2x32xf32>
    %cst_1 = arith.constant 0.000000e+00 : f32
    %2 = vector.broadcast %cst_1 : f32 to vector<2x32xf32>
    %c0 = arith.constant 0 : index
    %c0_2 = arith.constant 0 : index
    %c0_3 = arith.constant 0 : index
    %3 = vector.load %arg0[%c0, %c0_2, %c0_3] : memref<8x2x128xf32, #tpu.memory_space<vmem>>, vector<1x2x128xf32>
    %4 = vector.shape_cast %3 : vector<1x2x128xf32> to vector<2x128xf32>
    %c0_4 = arith.constant 0 : index
    %c0_5 = arith.constant 0 : index
    %5 = vector.load %arg1[%c0_4, %c0_5] : memref<32x128xf32, #tpu.memory_space<vmem>>, vector<32x128xf32>
    %cst_6 = arith.constant dense<0.000000e+00> : vector<2x128xf32>
    %6 = tpu.matmul %0, %5, %cst_6 {dimension_numbers = #tpu.dot_dimension_numbers<[1], [0], [0], [1], [0, 0, 1, 1], [], []>} : vector<2x32xf32>, vector<32x128xf32>, vector<2x128xf32> -> vector<2x128xf32>
    %7 = arith.addf %4, %6 : vector<2x128xf32>
    %8 = math.tanh %7 : vector<2x128xf32>
    %9 = vector.extract_strided_slice %8 {offsets = [0, 0], sizes = [2, 32], strides = [1, 1]} : vector<2x128xf32> to vector<2x32xf32>
    %cst_7 = arith.constant 5.000000e-01 : f32
    %10 = vector.broadcast %cst_7 : f32 to vector<2x32xf32>
    %11 = arith.mulf %10, %9 : vector<2x32xf32>
    %cst_8 = arith.constant 5.000000e-01 : f32
    %12 = vector.broadcast %cst_8 : f32 to vector<2x32xf32>
    %13 = arith.addf %11, %12 : vector<2x32xf32>
    %14 = vector.extract_strided_slice %8 {offsets = [0, 32], sizes = [2, 32], strides = [1, 1]} : vector<2x128xf32> to vector<2x32xf32>
    %cst_9 = arith.constant 5.000000e-01 : f32
    %15 = vector.broadcast %cst_9 : f32 to vector<2x32xf32>
    %16 = arith.mulf %15, %14 : vector<2x32xf32>
    %cst_10 = arith.constant 5.000000e-01 : f32
    %17 = vector.broadcast %cst_10 : f32 to vector<2x32xf32>
    %18 = arith.addf %16, %17 : vector<2x32xf32>
    %19 = vector.extract_strided_slice %8 {offsets = [0, 64], sizes = [2, 32], strides = [1, 1]} : vector<2x128xf32> to vector<2x32xf32>
    %cst_11 = arith.constant 5.000000e-01 : f32
    %20 = vector.broadcast %cst_11 : f32 to vector<2x32xf32>
    %21 = arith.mulf %20, %19 : vector<2x32xf32>
    %cst_12 = arith.constant 5.000000e-01 : f32
    %22 = vector.broadcast %cst_12 : f32 to vector<2x32xf32>
    %23 = arith.addf %21, %22 : vector<2x32xf32>
    %24 = vector.extract_strided_slice %8 {offsets = [0, 96], sizes = [2, 32], strides = [1, 1]} : vector<2x128xf32> to vector<2x32xf32>
    %25 = arith.mulf %18, %1 : vector<2x32xf32>
    %26 = arith.mulf %13, %24 : vector<2x32xf32>
    %27 = arith.addf %25, %26 : vector<2x32xf32>
    %28 = math.tanh %27 : vector<2x32xf32>
    %29 = arith.mulf %23, %28 : vector<2x32xf32>
    %c0_13 = arith.constant 0 : index
    %c0_14 = arith.constant 0 : index
    %c0_15 = arith.constant 0 : index
    %30 = vector.load %arg2[%c0_13, %c0_14, %c0_15] : memref<8x1x32xf32, #tpu.memory_space<vmem>>, vector<1x1x32xf32>
    %31 = vector.shape_cast %30 : vector<1x1x32xf32> to vector<1x32xf32>
    %32 = vector.broadcast %31 : vector<1x32xf32> to vector<2x32xf32>
    %33 = arith.mulf %29, %32 : vector<2x32xf32>
    %34 = arith.addf %2, %33 : vector<2x32xf32>
    %c1 = arith.constant 1 : index
    %c0_16 = arith.constant 0 : index
    %c0_17 = arith.constant 0 : index
    %35 = vector.load %arg0[%c1, %c0_16, %c0_17] : memref<8x2x128xf32, #tpu.memory_space<vmem>>, vector<1x2x128xf32>
    %36 = vector.shape_cast %35 : vector<1x2x128xf32> to vector<2x128xf32>
    %c0_18 = arith.constant 0 : index
    %c0_19 = arith.constant 0 : index
    %37 = vector.load %arg1[%c0_18, %c0_19] : memref<32x128xf32, #tpu.memory_space<vmem>>, vector<32x128xf32>
    %cst_20 = arith.constant dense<0.000000e+00> : vector<2x128xf32>
    %38 = tpu.matmul %29, %37, %cst_20 {dimension_numbers = #tpu.dot_dimension_numbers<[1], [0], [0], [1], [0, 0, 1, 1], [], []>} : vector<2x32xf32>, vector<32x128xf32>, vector<2x128xf32> -> vector<2x128xf32>
    %39 = arith.addf %36, %38 : vector<2x128xf32>
    %40 = math.tanh %39 : vector<2x128xf32>
    %41 = vector.extract_strided_slice %40 {offsets = [0, 0], sizes = [2, 32], strides = [1, 1]} : vector<2x128xf32> to vector<2x32xf32>
    %cst_21 = arith.constant 5.000000e-01 : f32
    %42 = vector.broadcast %cst_21 : f32 to vector<2x32xf32>
    %43 = arith.mulf %42, %41 : vector<2x32xf32>
    %cst_22 = arith.constant 5.000000e-01 : f32
    %44 = vector.broadcast %cst_22 : f32 to vector<2x32xf32>
    %45 = arith.addf %43, %44 : vector<2x32xf32>
    %46 = vector.extract_strided_slice %40 {offsets = [0, 32], sizes = [2, 32], strides = [1, 1]} : vector<2x128xf32> to vector<2x32xf32>
    %cst_23 = arith.constant 5.000000e-01 : f32
    %47 = vector.broadcast %cst_23 : f32 to vector<2x32xf32>
    %48 = arith.mulf %47, %46 : vector<2x32xf32>
    %cst_24 = arith.constant 5.000000e-01 : f32
    %49 = vector.broadcast %cst_24 : f32 to vector<2x32xf32>
    %50 = arith.addf %48, %49 : vector<2x32xf32>
    %51 = vector.extract_strided_slice %40 {offsets = [0, 64], sizes = [2, 32], strides = [1, 1]} : vector<2x128xf32> to vector<2x32xf32>
    %cst_25 = arith.constant 5.000000e-01 : f32
    %52 = vector.broadcast %cst_25 : f32 to vector<2x32xf32>
    %53 = arith.mulf %52, %51 : vector<2x32xf32>
    %cst_26 = arith.constant 5.000000e-01 : f32
    %54 = vector.broadcast %cst_26 : f32 to vector<2x32xf32>
    %55 = arith.addf %53, %54 : vector<2x32xf32>
    %56 = vector.extract_strided_slice %40 {offsets = [0, 96], sizes = [2, 32], strides = [1, 1]} : vector<2x128xf32> to vector<2x32xf32>
    %57 = arith.mulf %50, %27 : vector<2x32xf32>
    %58 = arith.mulf %45, %56 : vector<2x32xf32>
    %59 = arith.addf %57, %58 : vector<2x32xf32>
    %60 = math.tanh %59 : vector<2x32xf32>
    %61 = arith.mulf %55, %60 : vector<2x32xf32>
    %c1_27 = arith.constant 1 : index
    %c0_28 = arith.constant 0 : index
    %c0_29 = arith.constant 0 : index
    %62 = vector.load %arg2[%c1_27, %c0_28, %c0_29] : memref<8x1x32xf32, #tpu.memory_space<vmem>>, vector<1x1x32xf32>
    %63 = vector.shape_cast %62 : vector<1x1x32xf32> to vector<1x32xf32>
    %64 = vector.broadcast %63 : vector<1x32xf32> to vector<2x32xf32>
    %65 = arith.mulf %61, %64 : vector<2x32xf32>
    %66 = arith.addf %34, %65 : vector<2x32xf32>
    %c2 = arith.constant 2 : index
    %c0_30 = arith.constant 0 : index
    %c0_31 = arith.constant 0 : index
    %67 = vector.load %arg0[%c2, %c0_30, %c0_31] : memref<8x2x128xf32, #tpu.memory_space<vmem>>, vector<1x2x128xf32>
    %68 = vector.shape_cast %67 : vector<1x2x128xf32> to vector<2x128xf32>
    %c0_32 = arith.constant 0 : index
    %c0_33 = arith.constant 0 : index
    %69 = vector.load %arg1[%c0_32, %c0_33] : memref<32x128xf32, #tpu.memory_space<vmem>>, vector<32x128xf32>
    %cst_34 = arith.constant dense<0.000000e+00> : vector<2x128xf32>
    %70 = tpu.matmul %61, %69, %cst_34 {dimension_numbers = #tpu.dot_dimension_numbers<[1], [0], [0], [1], [0, 0, 1, 1], [], []>} : vector<2x32xf32>, vector<32x128xf32>, vector<2x128xf32> -> vector<2x128xf32>
    %71 = arith.addf %68, %70 : vector<2x128xf32>
    %72 = math.tanh %71 : vector<2x128xf32>
    %73 = vector.extract_strided_slice %72 {offsets = [0, 0], sizes = [2, 32], strides = [1, 1]} : vector<2x128xf32> to vector<2x32xf32>
    %cst_35 = arith.constant 5.000000e-01 : f32
    %74 = vector.broadcast %cst_35 : f32 to vector<2x32xf32>
    %75 = arith.mulf %74, %73 : vector<2x32xf32>
    %cst_36 = arith.constant 5.000000e-01 : f32
    %76 = vector.broadcast %cst_36 : f32 to vector<2x32xf32>
    %77 = arith.addf %75, %76 : vector<2x32xf32>
    %78 = vector.extract_strided_slice %72 {offsets = [0, 32], sizes = [2, 32], strides = [1, 1]} : vector<2x128xf32> to vector<2x32xf32>
    %cst_37 = arith.constant 5.000000e-01 : f32
    %79 = vector.broadcast %cst_37 : f32 to vector<2x32xf32>
    %80 = arith.mulf %79, %78 : vector<2x32xf32>
    %cst_38 = arith.constant 5.000000e-01 : f32
    %81 = vector.broadcast %cst_38 : f32 to vector<2x32xf32>
    %82 = arith.addf %80, %81 : vector<2x32xf32>
    %83 = vector.extract_strided_slice %72 {offsets = [0, 64], sizes = [2, 32], strides = [1, 1]} : vector<2x128xf32> to vector<2x32xf32>
    %cst_39 = arith.constant 5.000000e-01 : f32
    %84 = vector.broadcast %cst_39 : f32 to vector<2x32xf32>
    %85 = arith.mulf %84, %83 : vector<2x32xf32>
    %cst_40 = arith.constant 5.000000e-01 : f32
    %86 = vector.broadcast %cst_40 : f32 to vector<2x32xf32>
    %87 = arith.addf %85, %86 : vector<2x32xf32>
    %88 = vector.extract_strided_slice %72 {offsets = [0, 96], sizes = [2, 32], strides = [1, 1]} : vector<2x128xf32> to vector<2x32xf32>
    %89 = arith.mulf %82, %59 : vector<2x32xf32>
    %90 = arith.mulf %77, %88 : vector<2x32xf32>
    %91 = arith.addf %89, %90 : vector<2x32xf32>
    %92 = math.tanh %91 : vector<2x32xf32>
    %93 = arith.mulf %87, %92 : vector<2x32xf32>
    %c2_41 = arith.constant 2 : index
    %c0_42 = arith.constant 0 : index
    %c0_43 = arith.constant 0 : index
    %94 = vector.load %arg2[%c2_41, %c0_42, %c0_43] : memref<8x1x32xf32, #tpu.memory_space<vmem>>, vector<1x1x32xf32>
    %95 = vector.shape_cast %94 : vector<1x1x32xf32> to vector<1x32xf32>
    %96 = vector.broadcast %95 : vector<1x32xf32> to vector<2x32xf32>
    %97 = arith.mulf %93, %96 : vector<2x32xf32>
    %98 = arith.addf %66, %97 : vector<2x32xf32>
    %c3 = arith.constant 3 : index
    %c0_44 = arith.constant 0 : index
    %c0_45 = arith.constant 0 : index
    %99 = vector.load %arg0[%c3, %c0_44, %c0_45] : memref<8x2x128xf32, #tpu.memory_space<vmem>>, vector<1x2x128xf32>
    %100 = vector.shape_cast %99 : vector<1x2x128xf32> to vector<2x128xf32>
    %c0_46 = arith.constant 0 : index
    %c0_47 = arith.constant 0 : index
    %101 = vector.load %arg1[%c0_46, %c0_47] : memref<32x128xf32, #tpu.memory_space<vmem>>, vector<32x128xf32>
    %cst_48 = arith.constant dense<0.000000e+00> : vector<2x128xf32>
    %102 = tpu.matmul %93, %101, %cst_48 {dimension_numbers = #tpu.dot_dimension_numbers<[1], [0], [0], [1], [0, 0, 1, 1], [], []>} : vector<2x32xf32>, vector<32x128xf32>, vector<2x128xf32> -> vector<2x128xf32>
    %103 = arith.addf %100, %102 : vector<2x128xf32>
    %104 = math.tanh %103 : vector<2x128xf32>
    %105 = vector.extract_strided_slice %104 {offsets = [0, 0], sizes = [2, 32], strides = [1, 1]} : vector<2x128xf32> to vector<2x32xf32>
    %cst_49 = arith.constant 5.000000e-01 : f32
    %106 = vector.broadcast %cst_49 : f32 to vector<2x32xf32>
    %107 = arith.mulf %106, %105 : vector<2x32xf32>
    %cst_50 = arith.constant 5.000000e-01 : f32
    %108 = vector.broadcast %cst_50 : f32 to vector<2x32xf32>
    %109 = arith.addf %107, %108 : vector<2x32xf32>
    %110 = vector.extract_strided_slice %104 {offsets = [0, 32], sizes = [2, 32], strides = [1, 1]} : vector<2x128xf32> to vector<2x32xf32>
    %cst_51 = arith.constant 5.000000e-01 : f32
    %111 = vector.broadcast %cst_51 : f32 to vector<2x32xf32>
    %112 = arith.mulf %111, %110 : vector<2x32xf32>
    %cst_52 = arith.constant 5.000000e-01 : f32
    %113 = vector.broadcast %cst_52 : f32 to vector<2x32xf32>
    %114 = arith.addf %112, %113 : vector<2x32xf32>
    %115 = vector.extract_strided_slice %104 {offsets = [0, 64], sizes = [2, 32], strides = [1, 1]} : vector<2x128xf32> to vector<2x32xf32>
    %cst_53 = arith.constant 5.000000e-01 : f32
    %116 = vector.broadcast %cst_53 : f32 to vector<2x32xf32>
    %117 = arith.mulf %116, %115 : vector<2x32xf32>
    %cst_54 = arith.constant 5.000000e-01 : f32
    %118 = vector.broadcast %cst_54 : f32 to vector<2x32xf32>
    %119 = arith.addf %117, %118 : vector<2x32xf32>
    %120 = vector.extract_strided_slice %104 {offsets = [0, 96], sizes = [2, 32], strides = [1, 1]} : vector<2x128xf32> to vector<2x32xf32>
    %121 = arith.mulf %114, %91 : vector<2x32xf32>
    %122 = arith.mulf %109, %120 : vector<2x32xf32>
    %123 = arith.addf %121, %122 : vector<2x32xf32>
    %124 = math.tanh %123 : vector<2x32xf32>
    %125 = arith.mulf %119, %124 : vector<2x32xf32>
    %c3_55 = arith.constant 3 : index
    %c0_56 = arith.constant 0 : index
    %c0_57 = arith.constant 0 : index
    %126 = vector.load %arg2[%c3_55, %c0_56, %c0_57] : memref<8x1x32xf32, #tpu.memory_space<vmem>>, vector<1x1x32xf32>
    %127 = vector.shape_cast %126 : vector<1x1x32xf32> to vector<1x32xf32>
    %128 = vector.broadcast %127 : vector<1x32xf32> to vector<2x32xf32>
    %129 = arith.mulf %125, %128 : vector<2x32xf32>
    %130 = arith.addf %98, %129 : vector<2x32xf32>
    %c4 = arith.constant 4 : index
    %c0_58 = arith.constant 0 : index
    %c0_59 = arith.constant 0 : index
    %131 = vector.load %arg0[%c4, %c0_58, %c0_59] : memref<8x2x128xf32, #tpu.memory_space<vmem>>, vector<1x2x128xf32>
    %132 = vector.shape_cast %131 : vector<1x2x128xf32> to vector<2x128xf32>
    %c0_60 = arith.constant 0 : index
    %c0_61 = arith.constant 0 : index
    %133 = vector.load %arg1[%c0_60, %c0_61] : memref<32x128xf32, #tpu.memory_space<vmem>>, vector<32x128xf32>
    %cst_62 = arith.constant dense<0.000000e+00> : vector<2x128xf32>
    %134 = tpu.matmul %125, %133, %cst_62 {dimension_numbers = #tpu.dot_dimension_numbers<[1], [0], [0], [1], [0, 0, 1, 1], [], []>} : vector<2x32xf32>, vector<32x128xf32>, vector<2x128xf32> -> vector<2x128xf32>
    %135 = arith.addf %132, %134 : vector<2x128xf32>
    %136 = math.tanh %135 : vector<2x128xf32>
    %137 = vector.extract_strided_slice %136 {offsets = [0, 0], sizes = [2, 32], strides = [1, 1]} : vector<2x128xf32> to vector<2x32xf32>
    %cst_63 = arith.constant 5.000000e-01 : f32
    %138 = vector.broadcast %cst_63 : f32 to vector<2x32xf32>
    %139 = arith.mulf %138, %137 : vector<2x32xf32>
    %cst_64 = arith.constant 5.000000e-01 : f32
    %140 = vector.broadcast %cst_64 : f32 to vector<2x32xf32>
    %141 = arith.addf %139, %140 : vector<2x32xf32>
    %142 = vector.extract_strided_slice %136 {offsets = [0, 32], sizes = [2, 32], strides = [1, 1]} : vector<2x128xf32> to vector<2x32xf32>
    %cst_65 = arith.constant 5.000000e-01 : f32
    %143 = vector.broadcast %cst_65 : f32 to vector<2x32xf32>
    %144 = arith.mulf %143, %142 : vector<2x32xf32>
    %cst_66 = arith.constant 5.000000e-01 : f32
    %145 = vector.broadcast %cst_66 : f32 to vector<2x32xf32>
    %146 = arith.addf %144, %145 : vector<2x32xf32>
    %147 = vector.extract_strided_slice %136 {offsets = [0, 64], sizes = [2, 32], strides = [1, 1]} : vector<2x128xf32> to vector<2x32xf32>
    %cst_67 = arith.constant 5.000000e-01 : f32
    %148 = vector.broadcast %cst_67 : f32 to vector<2x32xf32>
    %149 = arith.mulf %148, %147 : vector<2x32xf32>
    %cst_68 = arith.constant 5.000000e-01 : f32
    %150 = vector.broadcast %cst_68 : f32 to vector<2x32xf32>
    %151 = arith.addf %149, %150 : vector<2x32xf32>
    %152 = vector.extract_strided_slice %136 {offsets = [0, 96], sizes = [2, 32], strides = [1, 1]} : vector<2x128xf32> to vector<2x32xf32>
    %153 = arith.mulf %146, %123 : vector<2x32xf32>
    %154 = arith.mulf %141, %152 : vector<2x32xf32>
    %155 = arith.addf %153, %154 : vector<2x32xf32>
    %156 = math.tanh %155 : vector<2x32xf32>
    %157 = arith.mulf %151, %156 : vector<2x32xf32>
    %c4_69 = arith.constant 4 : index
    %c0_70 = arith.constant 0 : index
    %c0_71 = arith.constant 0 : index
    %158 = vector.load %arg2[%c4_69, %c0_70, %c0_71] : memref<8x1x32xf32, #tpu.memory_space<vmem>>, vector<1x1x32xf32>
    %159 = vector.shape_cast %158 : vector<1x1x32xf32> to vector<1x32xf32>
    %160 = vector.broadcast %159 : vector<1x32xf32> to vector<2x32xf32>
    %161 = arith.mulf %157, %160 : vector<2x32xf32>
    %162 = arith.addf %130, %161 : vector<2x32xf32>
    %c5 = arith.constant 5 : index
    %c0_72 = arith.constant 0 : index
    %c0_73 = arith.constant 0 : index
    %163 = vector.load %arg0[%c5, %c0_72, %c0_73] : memref<8x2x128xf32, #tpu.memory_space<vmem>>, vector<1x2x128xf32>
    %164 = vector.shape_cast %163 : vector<1x2x128xf32> to vector<2x128xf32>
    %c0_74 = arith.constant 0 : index
    %c0_75 = arith.constant 0 : index
    %165 = vector.load %arg1[%c0_74, %c0_75] : memref<32x128xf32, #tpu.memory_space<vmem>>, vector<32x128xf32>
    %cst_76 = arith.constant dense<0.000000e+00> : vector<2x128xf32>
    %166 = tpu.matmul %157, %165, %cst_76 {dimension_numbers = #tpu.dot_dimension_numbers<[1], [0], [0], [1], [0, 0, 1, 1], [], []>} : vector<2x32xf32>, vector<32x128xf32>, vector<2x128xf32> -> vector<2x128xf32>
    %167 = arith.addf %164, %166 : vector<2x128xf32>
    %168 = math.tanh %167 : vector<2x128xf32>
    %169 = vector.extract_strided_slice %168 {offsets = [0, 0], sizes = [2, 32], strides = [1, 1]} : vector<2x128xf32> to vector<2x32xf32>
    %cst_77 = arith.constant 5.000000e-01 : f32
    %170 = vector.broadcast %cst_77 : f32 to vector<2x32xf32>
    %171 = arith.mulf %170, %169 : vector<2x32xf32>
    %cst_78 = arith.constant 5.000000e-01 : f32
    %172 = vector.broadcast %cst_78 : f32 to vector<2x32xf32>
    %173 = arith.addf %171, %172 : vector<2x32xf32>
    %174 = vector.extract_strided_slice %168 {offsets = [0, 32], sizes = [2, 32], strides = [1, 1]} : vector<2x128xf32> to vector<2x32xf32>
    %cst_79 = arith.constant 5.000000e-01 : f32
    %175 = vector.broadcast %cst_79 : f32 to vector<2x32xf32>
    %176 = arith.mulf %175, %174 : vector<2x32xf32>
    %cst_80 = arith.constant 5.000000e-01 : f32
    %177 = vector.broadcast %cst_80 : f32 to vector<2x32xf32>
    %178 = arith.addf %176, %177 : vector<2x32xf32>
    %179 = vector.extract_strided_slice %168 {offsets = [0, 64], sizes = [2, 32], strides = [1, 1]} : vector<2x128xf32> to vector<2x32xf32>
    %cst_81 = arith.constant 5.000000e-01 : f32
    %180 = vector.broadcast %cst_81 : f32 to vector<2x32xf32>
    %181 = arith.mulf %180, %179 : vector<2x32xf32>
    %cst_82 = arith.constant 5.000000e-01 : f32
    %182 = vector.broadcast %cst_82 : f32 to vector<2x32xf32>
    %183 = arith.addf %181, %182 : vector<2x32xf32>
    %184 = vector.extract_strided_slice %168 {offsets = [0, 96], sizes = [2, 32], strides = [1, 1]} : vector<2x128xf32> to vector<2x32xf32>
    %185 = arith.mulf %178, %155 : vector<2x32xf32>
    %186 = arith.mulf %173, %184 : vector<2x32xf32>
    %187 = arith.addf %185, %186 : vector<2x32xf32>
    %188 = math.tanh %187 : vector<2x32xf32>
    %189 = arith.mulf %183, %188 : vector<2x32xf32>
    %c5_83 = arith.constant 5 : index
    %c0_84 = arith.constant 0 : index
    %c0_85 = arith.constant 0 : index
    %190 = vector.load %arg2[%c5_83, %c0_84, %c0_85] : memref<8x1x32xf32, #tpu.memory_space<vmem>>, vector<1x1x32xf32>
    %191 = vector.shape_cast %190 : vector<1x1x32xf32> to vector<1x32xf32>
    %192 = vector.broadcast %191 : vector<1x32xf32> to vector<2x32xf32>
    %193 = arith.mulf %189, %192 : vector<2x32xf32>
    %194 = arith.addf %162, %193 : vector<2x32xf32>
    %c6 = arith.constant 6 : index
    %c0_86 = arith.constant 0 : index
    %c0_87 = arith.constant 0 : index
    %195 = vector.load %arg0[%c6, %c0_86, %c0_87] : memref<8x2x128xf32, #tpu.memory_space<vmem>>, vector<1x2x128xf32>
    %196 = vector.shape_cast %195 : vector<1x2x128xf32> to vector<2x128xf32>
    %c0_88 = arith.constant 0 : index
    %c0_89 = arith.constant 0 : index
    %197 = vector.load %arg1[%c0_88, %c0_89] : memref<32x128xf32, #tpu.memory_space<vmem>>, vector<32x128xf32>
    %cst_90 = arith.constant dense<0.000000e+00> : vector<2x128xf32>
    %198 = tpu.matmul %189, %197, %cst_90 {dimension_numbers = #tpu.dot_dimension_numbers<[1], [0], [0], [1], [0, 0, 1, 1], [], []>} : vector<2x32xf32>, vector<32x128xf32>, vector<2x128xf32> -> vector<2x128xf32>
    %199 = arith.addf %196, %198 : vector<2x128xf32>
    %200 = math.tanh %199 : vector<2x128xf32>
    %201 = vector.extract_strided_slice %200 {offsets = [0, 0], sizes = [2, 32], strides = [1, 1]} : vector<2x128xf32> to vector<2x32xf32>
    %cst_91 = arith.constant 5.000000e-01 : f32
    %202 = vector.broadcast %cst_91 : f32 to vector<2x32xf32>
    %203 = arith.mulf %202, %201 : vector<2x32xf32>
    %cst_92 = arith.constant 5.000000e-01 : f32
    %204 = vector.broadcast %cst_92 : f32 to vector<2x32xf32>
    %205 = arith.addf %203, %204 : vector<2x32xf32>
    %206 = vector.extract_strided_slice %200 {offsets = [0, 32], sizes = [2, 32], strides = [1, 1]} : vector<2x128xf32> to vector<2x32xf32>
    %cst_93 = arith.constant 5.000000e-01 : f32
    %207 = vector.broadcast %cst_93 : f32 to vector<2x32xf32>
    %208 = arith.mulf %207, %206 : vector<2x32xf32>
    %cst_94 = arith.constant 5.000000e-01 : f32
    %209 = vector.broadcast %cst_94 : f32 to vector<2x32xf32>
    %210 = arith.addf %208, %209 : vector<2x32xf32>
    %211 = vector.extract_strided_slice %200 {offsets = [0, 64], sizes = [2, 32], strides = [1, 1]} : vector<2x128xf32> to vector<2x32xf32>
    %cst_95 = arith.constant 5.000000e-01 : f32
    %212 = vector.broadcast %cst_95 : f32 to vector<2x32xf32>
    %213 = arith.mulf %212, %211 : vector<2x32xf32>
    %cst_96 = arith.constant 5.000000e-01 : f32
    %214 = vector.broadcast %cst_96 : f32 to vector<2x32xf32>
    %215 = arith.addf %213, %214 : vector<2x32xf32>
    %216 = vector.extract_strided_slice %200 {offsets = [0, 96], sizes = [2, 32], strides = [1, 1]} : vector<2x128xf32> to vector<2x32xf32>
    %217 = arith.mulf %210, %187 : vector<2x32xf32>
    %218 = arith.mulf %205, %216 : vector<2x32xf32>
    %219 = arith.addf %217, %218 : vector<2x32xf32>
    %220 = math.tanh %219 : vector<2x32xf32>
    %221 = arith.mulf %215, %220 : vector<2x32xf32>
    %c6_97 = arith.constant 6 : index
    %c0_98 = arith.constant 0 : index
    %c0_99 = arith.constant 0 : index
    %222 = vector.load %arg2[%c6_97, %c0_98, %c0_99] : memref<8x1x32xf32, #tpu.memory_space<vmem>>, vector<1x1x32xf32>
    %223 = vector.shape_cast %222 : vector<1x1x32xf32> to vector<1x32xf32>
    %224 = vector.broadcast %223 : vector<1x32xf32> to vector<2x32xf32>
    %225 = arith.mulf %221, %224 : vector<2x32xf32>
    %226 = arith.addf %194, %225 : vector<2x32xf32>
    %c7 = arith.constant 7 : index
    %c0_100 = arith.constant 0 : index
    %c0_101 = arith.constant 0 : index
    %227 = vector.load %arg0[%c7, %c0_100, %c0_101] : memref<8x2x128xf32, #tpu.memory_space<vmem>>, vector<1x2x128xf32>
    %228 = vector.shape_cast %227 : vector<1x2x128xf32> to vector<2x128xf32>
    %c0_102 = arith.constant 0 : index
    %c0_103 = arith.constant 0 : index
    %229 = vector.load %arg1[%c0_102, %c0_103] : memref<32x128xf32, #tpu.memory_space<vmem>>, vector<32x128xf32>
    %cst_104 = arith.constant dense<0.000000e+00> : vector<2x128xf32>
    %230 = tpu.matmul %221, %229, %cst_104 {dimension_numbers = #tpu.dot_dimension_numbers<[1], [0], [0], [1], [0, 0, 1, 1], [], []>} : vector<2x32xf32>, vector<32x128xf32>, vector<2x128xf32> -> vector<2x128xf32>
    %231 = arith.addf %228, %230 : vector<2x128xf32>
    %232 = math.tanh %231 : vector<2x128xf32>
    %233 = vector.extract_strided_slice %232 {offsets = [0, 0], sizes = [2, 32], strides = [1, 1]} : vector<2x128xf32> to vector<2x32xf32>
    %cst_105 = arith.constant 5.000000e-01 : f32
    %234 = vector.broadcast %cst_105 : f32 to vector<2x32xf32>
    %235 = arith.mulf %234, %233 : vector<2x32xf32>
    %cst_106 = arith.constant 5.000000e-01 : f32
    %236 = vector.broadcast %cst_106 : f32 to vector<2x32xf32>
    %237 = arith.addf %235, %236 : vector<2x32xf32>
    %238 = vector.extract_strided_slice %232 {offsets = [0, 32], sizes = [2, 32], strides = [1, 1]} : vector<2x128xf32> to vector<2x32xf32>
    %cst_107 = arith.constant 5.000000e-01 : f32
    %239 = vector.broadcast %cst_107 : f32 to vector<2x32xf32>
    %240 = arith.mulf %239, %238 : vector<2x32xf32>
    %cst_108 = arith.constant 5.000000e-01 : f32
    %241 = vector.broadcast %cst_108 : f32 to vector<2x32xf32>
    %242 = arith.addf %240, %241 : vector<2x32xf32>
    %243 = vector.extract_strided_slice %232 {offsets = [0, 64], sizes = [2, 32], strides = [1, 1]} : vector<2x128xf32> to vector<2x32xf32>
    %cst_109 = arith.constant 5.000000e-01 : f32
    %244 = vector.broadcast %cst_109 : f32 to vector<2x32xf32>
    %245 = arith.mulf %244, %243 : vector<2x32xf32>
    %cst_110 = arith.constant 5.000000e-01 : f32
    %246 = vector.broadcast %cst_110 : f32 to vector<2x32xf32>
    %247 = arith.addf %245, %246 : vector<2x32xf32>
    %248 = vector.extract_strided_slice %232 {offsets = [0, 96], sizes = [2, 32], strides = [1, 1]} : vector<2x128xf32> to vector<2x32xf32>
    %249 = arith.mulf %242, %219 : vector<2x32xf32>
    %250 = arith.mulf %237, %248 : vector<2x32xf32>
    %251 = arith.addf %249, %250 : vector<2x32xf32>
    %252 = math.tanh %251 : vector<2x32xf32>
    %253 = arith.mulf %247, %252 : vector<2x32xf32>
    %c7_111 = arith.constant 7 : index
    %c0_112 = arith.constant 0 : index
    %c0_113 = arith.constant 0 : index
    %254 = vector.load %arg2[%c7_111, %c0_112, %c0_113] : memref<8x1x32xf32, #tpu.memory_space<vmem>>, vector<1x1x32xf32>
    %255 = vector.shape_cast %254 : vector<1x1x32xf32> to vector<1x32xf32>
    %256 = vector.broadcast %255 : vector<1x32xf32> to vector<2x32xf32>
    %257 = arith.mulf %253, %256 : vector<2x32xf32>
    %258 = arith.addf %226, %257 : vector<2x32xf32>
    %cst_114 = arith.constant dense<0.000000e+00> : vector<2xf32>
    %259 = vector.multi_reduction <add>, %258, %cst_114 [1] : vector<2x32xf32> to vector<2xf32>
    %260 = vector.shape_cast %259 : vector<2xf32> to vector<2x1xf32>
    %c0_115 = arith.constant 0 : index
    %c0_116 = arith.constant 0 : index
    %261 = vector.load %arg3[%c0_115, %c0_116] : memref<1x1xf32, #tpu.memory_space<vmem>>, vector<1x1xf32>
    %262 = vector.broadcast %261 : vector<1x1xf32> to vector<2x1xf32>
    %263 = arith.addf %260, %262 : vector<2x1xf32>
    %c0_117 = arith.constant 0 : index
    %c0_118 = arith.constant 0 : index
    %264 = vector.load %arg4[%c0_117, %c0_118] : memref<2x1xf32, #tpu.memory_space<vmem>>, vector<2x1xf32>
    tpu.vector_store %arg4[%c0_117, %c0_118], %263 {strides = array<i32>} : memref<2x1xf32, #tpu.memory_space<vmem>>, vector<2x1xf32>,
    return
  }
}

</mosaic_0001>

<bundles_post_ra>
// kernel: lstm_forward.1
= control target key start
LH: loop header
LB: loop body
LE: loop exit
PB: predicated region body
PF: predicated region fallthrough
CT: control target
= control target key end

     0   :  { %v1116_v0 = vmov 0.0   ;;  %vm1117_vm0 = vmmov 0   ;;  %s1118_s24 = smov 32   ;;  %s1119_s25 = smov 64   ;;  %vm24_vm1 = vcmask 261120   ;;  %vm904_vm2 = vcmask 254976   ;;  %s1371_s1 = inlined_call_operand.vmem [shape: f32[32,128], index: 1, kind: input, shape index: {}]   ;;  %s1372_s0 = inlined_call_operand.vmem [shape: f32[8,2,128], index: 0, kind: input, shape index: {}]   ;;  %s1373_s2 = inlined_call_operand.vmem [shape: f32[8,1,32], index: 2, kind: input, shape index: {}]   ;;  %s1374_s3 = inlined_call_operand.<no memory space> [shape: f32[1,1], index: 3, kind: input, shape index: {}]   ;;  %s1375_s4 = inlined_call_operand.vmem [shape: f32[2,1], index: 4, kind: output, shape index: {}]  }
   0x1   :  { %992 = vmatprep.subr.mxu0 %v1116_v0  ;;  %v1149_v1 = vld [vmem:[%s1371_s1 + $0x18] sm:$0xff]  ;;  %v1154_v2 = vld [vmem:[%s1371_s1 + $0x10] sm:$0xff]  ;;  %1000 = vmatprep.mubr.msk.f32.mxu0 %vm1117_vm0, %v1116_v0  ;;  %v1164_v3 = vld [vmem:[%s1371_s1 + $0x8] sm:$0xff]  ;;  %vm916_vm3 = vcmask 1024  }
   0x2   :  { %993 = vmatpush3.msra.mxu0 %v1149_v1  ;;  %1003 = vmatprep.subr.mxu1 %v1116_v0  ;;  %v1173_v4 = vld [vmem:[%s1371_s1] sm:$0xff] }
   0x3   :  { %994 = vmatprep.subr.mxu0 %v1116_v0  ;;  %1004 = vmatpush3.msra.mxu1 %v1149_v1  ;;  %v19_v5 = vld [vmem:[%s1372_s0] sm:$0x3]  ;;  %v923_v21 = vld [vmem:[%s1372_s0 + $0x2] sm:$0x3]  ;;  %v927_v37 = vld [vmem:[%s1372_s0 + $0x4] sm:$0x3] }
   0x4   :  { %995 = vmatpush3.msra.mxu0 %v1154_v2  ;;  %1005 = vmatprep.subr.mxu1 %v1116_v0  ;;  %v931_v53 = vld [vmem:[%s1372_s0 + $0x6] sm:$0x3] }
   0x5   :  { %996 = vmatprep.subr.mxu0 %v1116_v0  ;;  %1006 = vmatpush3.msra.mxu1 %v1154_v2 }
   0x6   :  { %997 = vmatpush3.msra.mxu0 %v1164_v3  ;;  %1007 = vmatprep.subr.mxu1 %v1116_v0 }
   0x7   :  { %998 = vmatprep.subr.mxu0 %v1116_v0  ;;  %1008 = vmatpush3.msra.mxu1 %v1164_v3 }
   0x8   :  { %999 = vmatpush3.msra.mxu0 %v1173_v4  ;;  %1009 = vmatprep.subr.mxu1 %v1116_v0 }
   0x9   :  { %1001 = vmatmul.mubr.f32.vlgmr.msra.gmra.mxu0 %v1116_v0  ;;  %1010 = vmatpush3.msra.mxu1 %v1173_v4 }
   0xa   :  { %1011 = vmatprep.mubr.msk.f32.mxu1 %vm1117_vm0, %v1116_v0  ;;  %1014 = vmatprep.subr.mxu0 %v1116_v0 }
   0xb   :  { %1015 = vmatpush3.msra.mxu0 %v1149_v1  ;;  %1022 = vmatprep.mubr.msk.f32.mxu0 %vm1117_vm0, %v1116_v0 }
   0xc   :  { %1016 = vmatprep.subr.mxu0 %v1116_v0  ;;  %1025 = vmatprep.subr.mxu1 %v1116_v0 }
   0xd   :  { %1017 = vmatpush3.msra.mxu0 %v1154_v2 }
   0xe   :  { %1018 = vmatprep.subr.mxu0 %v1116_v0 }
   0xf   :  { %1019 = vmatpush3.msra.mxu0 %v1164_v3 }
  0x10   :  { %1020 = vmatprep.subr.mxu0 %v1116_v0 }
  0x11   :  { %1021 = vmatpush3.msra.mxu0 %v1173_v4 }
  0x12   :  { %1036 = vmatprep.subr.mxu0 %v1116_v0 }
  0xc9   :  { %v94_v6 = vpop.f32.mrf.mxu0 }
  0xca   :  { %v98_v7 = vadd.f32 %v94_v6, %v19_v5 }
  0xcb   :  { %v1002_v8 = vpop.f32.mrf.mxu0 }
  0xcc   :  { %1084 = vtanh.f32 %v98_v7 }
  0xd9   :  { %v1085_v9 = vpop.eup %1084 }
  0xda   :  { %104 = vrot.lane.b32.xlu0 %v1085_v9, %s1118_s24  ;;  %v100_v10 = vmul.f32 0.5, %v1085_v9 }
  0xdc   :  { %v101_v11 = vadd.f32 0.5, %v100_v10  ;;  %v935_v10 = vld [vmem:[%s1372_s0 + $0x8] sm:$0x3] }
  0xde   :  { %v102_v14 = vmul.f32 0.0, %v101_v11 }
 0x14c   :  { %v105_v12 = vpop.permute.xlu0 %104 }
 0x14d   :  { %v107_v13 = vmul.f32 %v105_v12, %v101_v11 }
 0x14f   :  { %109 = vrot.lane.b32.xlu0 %v107_v13, %s1118_s24 }
 0x1c1   :  { %v110_v15 = vpop.permute.xlu0 %109 }
 0x1c2   :  { %v112_v16 = vadd.f32 %v110_v15, %v102_v14 }
 0x1c4   :  { %1086 = vtanh.f32 %v112_v16 }
 0x1d1   :  { %v1087_v17 = vpop.eup %1086 }
 0x1d2   :  { %115 = vrot.lane.b32.xlu1 %v1087_v17, %s1118_s24 }
 0x244   :  { %v116_v18 = vpop.permute.xlu1 %115 }
 0x245   :  { %v1204_v19 = vmul.f32 %v116_v18, %v101_v11 }
 0x247   :  { %133 = vrot.lane.b32.xlu1 %v1204_v19, %s1119_s25 }
 0x2b9   :  { %v134_v20 = vpop.permute.xlu1 %133 }
 0x2ba   :  { %1012 = vmatmul.mubr.msk.f32.vlgmr.msra.gmra.mxu1 %vm24_vm1, %v134_v20 }
 0x2bb   :  { %1026 = vmatpush3.msra.mxu1 %v1149_v1  ;;  %1033 = vmatprep.mubr.msk.f32.mxu1 %vm1117_vm0, %v1116_v0 }
 0x2bc   :  { %1027 = vmatprep.subr.mxu1 %v1116_v0 }
 0x2bd   :  { %1028 = vmatpush3.msra.mxu1 %v1154_v2 }
 0x2be   :  { %1029 = vmatprep.subr.mxu1 %v1116_v0 }
 0x2bf   :  { %1030 = vmatpush3.msra.mxu1 %v1164_v3 }
 0x2c0   :  { %1031 = vmatprep.subr.mxu1 %v1116_v0 }
 0x2c1   :  { %1032 = vmatpush3.msra.mxu1 %v1173_v4 }
 0x2c2   :  { %1047 = vmatprep.subr.mxu1 %v1116_v0 }
 0x37a   :  { %v203_v22 = vpop.f32.mrf.mxu1 }
 0x37b   :  { %v207_v23 = vadd.f32 %v923_v21, %v203_v22 }
 0x37c   :  { %v1013_v24 = vpop.f32.mrf.mxu1 }
 0x37d   :  { %1088 = vtanh.f32 %v207_v23 }
 0x38a   :  { %v1089_v25 = vpop.eup %1088 }
 0x38b   :  { %213 = vrot.lane.b32.xlu0 %v1089_v25, %s1118_s24  ;;  %v209_v26 = vmul.f32 0.5, %v1089_v25 }
 0x38d   :  { %v210_v27 = vadd.f32 0.5, %v209_v26 }
 0x38f   :  { %v211_v30 = vmul.f32 %v210_v27, %v112_v16 }
 0x3fd   :  { %v214_v28 = vpop.permute.xlu0 %213 }
 0x3fe   :  { %v216_v29 = vmul.f32 %v214_v28, %v210_v27 }
 0x400   :  { %218 = vrot.lane.b32.xlu1 %v216_v29, %s1118_s24 }
 0x472   :  { %v219_v31 = vpop.permute.xlu1 %218 }
 0x473   :  { %v221_v32 = vadd.f32 %v219_v31, %v211_v30 }
 0x475   :  { %1090 = vtanh.f32 %v221_v32 }
 0x482   :  { %v1091_v33 = vpop.eup %1090 }
 0x483   :  { %224 = vrot.lane.b32.xlu0 %v1091_v33, %s1118_s24 }
 0x4f5   :  { %v225_v34 = vpop.permute.xlu0 %224 }
 0x4f6   :  { %v1225_v35 = vmul.f32 %v225_v34, %v210_v27  ;;  %v939_v27 = vld [vmem:[%s1372_s0 + $0xa] sm:$0x3] }
 0x4f8   :  { %243 = vrot.lane.b32.xlu1 %v1225_v35, %s1119_s25 }
 0x56a   :  { %v244_v36 = vpop.permute.xlu1 %243 }
 0x56b   :  { %1023 = vmatmul.mubr.msk.f32.vlgmr.msra.gmra.mxu0 %vm24_vm1, %v244_v36 }
 0x56c   :  { %1037 = vmatpush3.msra.mxu0 %v1149_v1  ;;  %1044 = vmatprep.mubr.msk.f32.mxu0 %vm1117_vm0, %v1116_v0 }
 0x56d   :  { %1038 = vmatprep.subr.mxu0 %v1116_v0 }
 0x56e   :  { %1039 = vmatpush3.msra.mxu0 %v1154_v2 }
 0x56f   :  { %1040 = vmatprep.subr.mxu0 %v1116_v0 }
 0x570   :  { %1041 = vmatpush3.msra.mxu0 %v1164_v3 }
 0x571   :  { %1042 = vmatprep.subr.mxu0 %v1116_v0 }
 0x572   :  { %1043 = vmatpush3.msra.mxu0 %v1173_v4 }
 0x573   :  { %1058 = vmatprep.subr.mxu0 %v1116_v0 }
 0x62b   :  { %v313_v38 = vpop.f32.mrf.mxu0 }
 0x62c   :  { %v317_v39 = vadd.f32 %v927_v37, %v313_v38 }
 0x62d   :  { %v1024_v40 = vpop.f32.mrf.mxu0 }
 0x62e   :  { %1092 = vtanh.f32 %v317_v39  ;;  %v943_v39 = vld [vmem:[%s1372_s0 + $0xc] sm:$0x3] }
 0x63b   :  { %v1093_v41 = vpop.eup %1092 }
 0x63c   :  { %323 = vrot.lane.b32.xlu0 %v1093_v41, %s1118_s24  ;;  %v319_v42 = vmul.f32 0.5, %v1093_v41 }
 0x63e   :  { %v320_v43 = vadd.f32 0.5, %v319_v42 }
 0x640   :  { %v321_v46 = vmul.f32 %v320_v43, %v221_v32 }
 0x6ae   :  { %v324_v44 = vpop.permute.xlu0 %323 }
 0x6af   :  { %v326_v45 = vmul.f32 %v324_v44, %v320_v43 }
 0x6b1   :  { %328 = vrot.lane.b32.xlu1 %v326_v45, %s1118_s24 }
 0x723   :  { %v329_v47 = vpop.permute.xlu1 %328 }
 0x724   :  { %v331_v48 = vadd.f32 %v329_v47, %v321_v46 }
 0x726   :  { %1094 = vtanh.f32 %v331_v48 }
 0x733   :  { %v1095_v49 = vpop.eup %1094 }
 0x734   :  { %334 = vrot.lane.b32.xlu0 %v1095_v49, %s1118_s24 }
 0x7a6   :  { %v335_v50 = vpop.permute.xlu0 %334 }
 0x7a7   :  { %v1246_v51 = vmul.f32 %v335_v50, %v320_v43 }
 0x7a9   :  { %353 = vrot.lane.b32.xlu1 %v1246_v51, %s1119_s25 }
 0x81b   :  { %v354_v52 = vpop.permute.xlu1 %353 }
 0x81c   :  { %1034 = vmatmul.mubr.msk.f32.vlgmr.msra.gmra.mxu1 %vm24_vm1, %v354_v52 }
 0x81d   :  { %1048 = vmatpush3.msra.mxu1 %v1149_v1  ;;  %1055 = vmatprep.mubr.msk.f32.mxu1 %vm1117_vm0, %v1116_v0 }
 0x81e   :  { %1049 = vmatprep.subr.mxu1 %v1116_v0 }
 0x81f   :  { %1050 = vmatpush3.msra.mxu1 %v1154_v2 }
 0x820   :  { %1051 = vmatprep.subr.mxu1 %v1116_v0 }
 0x821   :  { %1052 = vmatpush3.msra.mxu1 %v1164_v3 }
 0x822   :  { %1053 = vmatprep.subr.mxu1 %v1116_v0 }
 0x823   :  { %1054 = vmatpush3.msra.mxu1 %v1173_v4 }
 0x824   :  { %1069 = vmatprep.subr.mxu1 %v1116_v0 }
 0x8dc   :  { %v423_v54 = vpop.f32.mrf.mxu1 }
 0x8dd   :  { %v427_v55 = vadd.f32 %v931_v53, %v423_v54 }
 0x8de   :  { %v1035_v56 = vpop.f32.mrf.mxu1 }
 0x8df   :  { %1096 = vtanh.f32 %v427_v55  ;;  %v947_v56 = vld [vmem:[%s1372_s0 + $0xe] sm:$0x3] }
 0x8ec   :  { %v1097_v57 = vpop.eup %1096 }
 0x8ed   :  { %433 = vrot.lane.b32.xlu0 %v1097_v57, %s1118_s24  ;;  %v429_v58 = vmul.f32 0.5, %v1097_v57 }
 0x8ef   :  { %v430_v59 = vadd.f32 0.5, %v429_v58 }
 0x8f1   :  { %v431_v62 = vmul.f32 %v430_v59, %v331_v48 }
 0x95f   :  { %v434_v60 = vpop.permute.xlu0 %433 }
 0x960   :  { %v436_v61 = vmul.f32 %v434_v60, %v430_v59 }
 0x962   :  { %438 = vrot.lane.b32.xlu1 %v436_v61, %s1118_s24  ;;  %v922_v61 = vld [vmem:[%s1373_s2] ss:$0 sm:$0xff] }
 0x9d4   :  { %v439_v63 = vpop.permute.xlu1 %438 }
 0x9d5   :  { %v441_v5 = vadd.f32 %v439_v63, %v431_v62  ;;  %v930_v62 = vld [vmem:[%s1373_s2 + $0x2] ss:$0 sm:$0xff]  ;;  %v938_v63 = vld [vmem:[%s1373_s2 + $0x4] ss:$0 sm:$0xff] }
 0x9d7   :  { %1098 = vtanh.f32 %v441_v5 }
 0x9e4   :  { %v1099_v6 = vpop.eup %1098 }
 0x9e5   :  { %444 = vrot.lane.b32.xlu0 %v1099_v6, %s1118_s24 }
 0xa57   :  { %v445_v7 = vpop.permute.xlu0 %444 }
 0xa58   :  { %v1267_v8 = vmul.f32 %v445_v7, %v430_v59 }
 0xa5a   :  { %463 = vrot.lane.b32.xlu1 %v1267_v8, %s1119_s25 }
 0xacc   :  { %v464_v9 = vpop.permute.xlu1 %463 }
 0xacd   :  { %1045 = vmatmul.mubr.msk.f32.vlgmr.msra.gmra.mxu0 %vm24_vm1, %v464_v9 }
 0xace   :  { %1059 = vmatpush3.msra.mxu0 %v1149_v1  ;;  %1066 = vmatprep.mubr.msk.f32.mxu0 %vm1117_vm0, %v1116_v0 }
 0xacf   :  { %1060 = vmatprep.subr.mxu0 %v1116_v0 }
 0xad0   :  { %1061 = vmatpush3.msra.mxu0 %v1154_v2 }
 0xad1   :  { %1062 = vmatprep.subr.mxu0 %v1116_v0 }
 0xad2   :  { %1063 = vmatpush3.msra.mxu0 %v1164_v3 }
 0xad3   :  { %1064 = vmatprep.subr.mxu0 %v1116_v0 }
 0xad4   :  { %1065 = vmatpush3.msra.mxu0 %v1173_v4 }
 0xb8d   :  { %v533_v11 = vpop.f32.mrf.mxu0 }
 0xb8e   :  { %v537_v12 = vadd.f32 %v935_v10, %v533_v11  ;;  %v926_v11 = vld [vmem:[%s1373_s2 + $0x1] ss:$0 sm:$0xff] }
 0xb8f   :  { %v1046_v13 = vpop.f32.mrf.mxu0 }
 0xb90   :  { %1100 = vtanh.f32 %v537_v12  ;;  %v950_v12 = vld [vmem:[%s1373_s2 + $0x7] ss:$0 sm:$0xff]  ;;  %v934_v13 = vld [vmem:[%s1373_s2 + $0x3] ss:$0 sm:$0xff] }
 0xb9d   :  { %v1101_v14 = vpop.eup %1100 }
 0xb9e   :  { %543 = vrot.lane.b32.xlu0 %v1101_v14, %s1118_s24  ;;  %v539_v15 = vmul.f32 0.5, %v1101_v14  ;;  %v942_v14 = vld [vmem:[%s1373_s2 + $0x5] ss:$0 sm:$0xff] }
 0xba0   :  { %v540_v16 = vadd.f32 0.5, %v539_v15 }
 0xba2   :  { %v541_v20 = vmul.f32 %v540_v16, %v441_v5  ;;  %v946_v5 = vld [vmem:[%s1373_s2 + $0x6] ss:$0 sm:$0xff] }
 0xc10   :  { %v544_v17 = vpop.permute.xlu0 %543 }
 0xc11   :  { %v546_v18 = vmul.f32 %v544_v17, %v540_v16 }
 0xc13   :  { %548 = vrot.lane.b32.xlu1 %v546_v18, %s1118_s24 }
 0xc85   :  { %v549_v21 = vpop.permute.xlu1 %548 }
 0xc86   :  { %v551_v22 = vadd.f32 %v549_v21, %v541_v20 }
 0xc88   :  { %1102 = vtanh.f32 %v551_v22 }
 0xc95   :  { %v1103_v23 = vpop.eup %1102 }
 0xc96   :  { %554 = vrot.lane.b32.xlu0 %v1103_v23, %s1118_s24 }
 0xd08   :  { %v555_v24 = vpop.permute.xlu0 %554 }
 0xd09   :  { %v1287_v25 = vmul.f32 %v555_v24, %v540_v16 }
 0xd0b   :  { %573 = vrot.lane.b32.xlu1 %v1287_v25, %s1119_s25 }
 0xd7d   :  { %v574_v26 = vpop.permute.xlu1 %573 }
 0xd7e   :  { %1056 = vmatmul.mubr.msk.f32.vlgmr.msra.gmra.mxu1 %vm24_vm1, %v574_v26 }
 0xd7f   :  { %1070 = vmatpush3.msra.mxu1 %v1149_v1  ;;  %1077 = vmatprep.mubr.msk.f32.mxu1 %vm1117_vm0, %v1116_v0 }
 0xd80   :  { %1071 = vmatprep.subr.mxu1 %v1116_v0 }
 0xd81   :  { %1072 = vmatpush3.msra.mxu1 %v1154_v2 }
 0xd82   :  { %1073 = vmatprep.subr.mxu1 %v1116_v0 }
 0xd83   :  { %1074 = vmatpush3.msra.mxu1 %v1164_v3 }
 0xd84   :  { %1075 = vmatprep.subr.mxu1 %v1116_v0 }
 0xd85   :  { %1076 = vmatpush3.msra.mxu1 %v1173_v4 }
 0xe3e   :  { %v643_v1 = vpop.f32.mrf.mxu1 }
 0xe3f   :  { %v647_v28 = vadd.f32 %v939_v27, %v643_v1 }
 0xe40   :  { %v1057_v29 = vpop.f32.mrf.mxu1 }
 0xe41   :  { %1104 = vtanh.f32 %v647_v28 }
 0xe4e   :  { %v1105_v30 = vpop.eup %1104 }
 0xe4f   :  { %653 = vrot.lane.b32.xlu0 %v1105_v30, %s1118_s24  ;;  %v649_v2 = vmul.f32 0.5, %v1105_v30 }
 0xe51   :  { %v650_v31 = vadd.f32 0.5, %v649_v2 }
 0xe53   :  { %v651_v0 = vmul.f32 %v650_v31, %v551_v22 }
 0xec1   :  { %v654_v32 = vpop.permute.xlu0 %653 }
 0xec2   :  { %v656_v33 = vmul.f32 %v654_v32, %v650_v31 }
 0xec4   :  { %658 = vrot.lane.b32.xlu1 %v656_v33, %s1118_s24 }
 0xf36   :  { %v659_v3 = vpop.permute.xlu1 %658 }
 0xf37   :  { %v661_v4 = vadd.f32 %v659_v3, %v651_v0 }
 0xf39   :  { %1106 = vtanh.f32 %v661_v4 }
 0xf46   :  { %v1107_v34 = vpop.eup %1106 }
 0xf47   :  { %664 = vrot.lane.b32.xlu0 %v1107_v34, %s1118_s24 }
 0xfb9   :  { %v665_v36 = vpop.permute.xlu0 %664 }
 0xfba   :  { %v1307_v37 = vmul.f32 %v665_v36, %v650_v31 }
 0xfbc   :  { %683 = vrot.lane.b32.xlu1 %v1307_v37, %s1119_s25 }
0x102e   :  { %v684_v38 = vpop.permute.xlu1 %683 }
0x102f   :  { %1067 = vmatmul.mubr.msk.f32.vlgmr.msra.gmra.mxu0 %vm24_vm1, %v684_v38 }
0x10ef   :  { %v753_v40 = vpop.f32.mrf.mxu0 }
0x10f0   :  { %v757_v41 = vadd.f32 %v943_v39, %v753_v40 }
0x10f1   :  { %v1068_v42 = vpop.f32.mrf.mxu0 }
0x10f2   :  { %1108 = vtanh.f32 %v757_v41 }
0x10ff   :  { %v1109_v43 = vpop.eup %1108 }
0x1100   :  { %763 = vrot.lane.b32.xlu0 %v1109_v43, %s1118_s24  ;;  %v759_v44 = vmul.f32 0.5, %v1109_v43 }
0x1102   :  { %v760_v45 = vadd.f32 0.5, %v759_v44 }
0x1104   :  { %v761_v48 = vmul.f32 %v760_v45, %v661_v4 }
0x1172   :  { %v764_v46 = vpop.permute.xlu0 %763 }
0x1173   :  { %v766_v47 = vmul.f32 %v764_v46, %v760_v45 }
0x1175   :  { %768 = vrot.lane.b32.xlu1 %v766_v47, %s1118_s24 }
0x11e7   :  { %v769_v49 = vpop.permute.xlu1 %768 }
0x11e8   :  { %v771_v50 = vadd.f32 %v769_v49, %v761_v48 }
0x11ea   :  { %1110 = vtanh.f32 %v771_v50 }
0x11f7   :  { %v1111_v52 = vpop.eup %1110 }
0x11f8   :  { %774 = vrot.lane.b32.xlu0 %v1111_v52, %s1118_s24 }
0x126a   :  { %v775_v53 = vpop.permute.xlu0 %774 }
0x126b   :  { %v777_v54 = vmul.f32 %v775_v53, %v760_v45 }
0x126d   :  { %793 = vrot.lane.b32.xlu1 %v777_v54, %s1119_s25 }
0x12df   :  { %v794_v55 = vpop.permute.xlu1 %793 }
0x12e0   :  { %1078 = vmatmul.mubr.msk.f32.vlgmr.msra.gmra.mxu1 %vm24_vm1, %v794_v55 }
0x13a0   :  { %v863_v57 = vpop.f32.mrf.mxu1 }
0x13a1   :  { %v867_v58 = vadd.f32 %v947_v56, %v863_v57 }
0x13a2   :  { %v1079_v59 = vpop.f32.mrf.mxu1 }
0x13a3   :  { %1112 = vtanh.f32 %v867_v58 }
0x13b0   :  { %v1113_v60 = vpop.eup %1112 }
0x13b1   :  { %873 = vrot.lane.b32.xlu0 %v1113_v60, %s1118_s24  ;;  %v869_v6 = vmul.f32 0.5, %v1113_v60 }
0x13b3   :  { %v870_v7 = vadd.f32 0.5, %v869_v6 }
0x13b5   :  { %125 = vrot.lane.b32.xlu0 %v922_v61, %s1119_s25  ;;  %v871_v15 = vmul.f32 %v870_v7, %v771_v50 }
0x13b9   :  { %345 = vrot.lane.b32.xlu0 %v930_v62, %s1119_s25 }
0x13bd   :  { %565 = vrot.lane.b32.xlu0 %v938_v63, %s1119_s25 }
0x13c1   :  { %785 = vrot.lane.b32.xlu0 %v946_v5, %s1119_s25 }
0x13c5   :  { %895 = vrot.lane.b32.xlu0 %v950_v12, %s1119_s25 }
0x1423   :  { %v874_v9 = vpop.permute.xlu0 %873 }
0x1424   :  { %v876_v10 = vmul.f32 %v874_v9, %v870_v7 }
0x1426   :  { %878 = vrot.lane.b32.xlu1 %v876_v10, %s1118_s24 }
0x1427   :  { %v126_v20 = vpop.permute.xlu0 %125 }
0x1428   :  { %v128_v23 = vmul.f32 %v126_v20, %v1204_v19  ;;  %v9_v19 = vstv %s1374_s3 }
0x1429   :  { %10 = vst [vmem:[#allocation2] sm:$0x1] %v9_v19 }
0x142a   :  { %235 = vrot.lane.b32.xlu1 %v926_v11, %s1119_s25 }
0x142b   :  { %v346_v24 = vpop.permute.xlu0 %345 }
0x142c   :  { %v348_v1 = vmul.f32 %v346_v24, %v1246_v51 }
0x142e   :  { %455 = vrot.lane.b32.xlu1 %v934_v13, %s1119_s25 }
0x142f   :  { %v566_v30 = vpop.permute.xlu0 %565 }
0x1430   :  { %v568_v32 = vmul.f32 %v566_v30, %v1287_v25 }
0x1432   :  { %675 = vrot.lane.b32.xlu1 %v942_v14, %s1119_s25 }
0x1433   :  { %v786_v3 = vpop.permute.xlu0 %785 }
0x1434   :  { %v788_v34 = vmul.f32 %v786_v3, %v777_v54 }
0x1437   :  { %v896_v51 = vpop.permute.xlu0 %895 }
0x1498   :  { %v879_v16 = vpop.permute.xlu1 %878 }
0x1499   :  { %v881_v17 = vadd.f32 %v879_v16, %v871_v15 }
0x149b   :  { %1114 = vtanh.f32 %v881_v17 }
0x149c   :  { %v236_v21 = vpop.permute.xlu1 %235 }
0x149d   :  { %v238_v22 = vmul.f32 %v236_v21, %v1225_v35 }
0x149f   :  { %v239_v26 = vadd.f32 %v238_v22, %v128_v23 }
0x14a0   :  { %v456_v27 = vpop.permute.xlu1 %455 }
0x14a1   :  { %v349_v28 = vadd.f32 %v348_v1, %v239_v26  ;;  %v458_v29 = vmul.f32 %v456_v27, %v1267_v8 }
0x14a3   :  { %v459_v2 = vadd.f32 %v458_v29, %v349_v28 }
0x14a4   :  { %v676_v31 = vpop.permute.xlu1 %675 }
0x14a5   :  { %v569_v33 = vadd.f32 %v568_v32, %v459_v2  ;;  %v678_v0 = vmul.f32 %v676_v31, %v1307_v37  ;;  %v951_v37 = vld [vmem:[#allocation2] ss:$0 sm:$0xff] }
0x14a7   :  { %v679_v35 = vadd.f32 %v678_v0, %v569_v33 }
0x14a8   :  { %v1115_v18 = vpop.eup %1114 }
0x14a9   :  { %884 = vrot.lane.b32.xlu1 %v1115_v18, %s1118_s24  ;;  %v789_v8 = vadd.f32 %v788_v34, %v679_v35 }
0x151b   :  { %v885_v4 = vpop.permute.xlu1 %884 }
0x151c   :  { %v887_v36 = vmul.f32 %v885_v4, %v870_v7 }
0x151e   :  { %v898_v38 = vmul.f32 %v896_v51, %v887_v36 }
0x1520   :  { %v899_v39 = vadd.f32 %v898_v38, %v789_v8 }
0x1522   :  { %901 = vrot.lane.b32.xlu1 %v899_v39, %s1119_s25 }
0x1594   :  { %v902_v25 = vpop.permute.xlu1 %901 }
0x1595   :  { %v905_v40 = vsel %vm904_vm2, %v902_v25, 0.0 }
0x1596   :  { %906 = vadd.xlane.f32.xlu0 %v905_v40 }
0x161f   :  { %v907_v41 = vpop.xlane.xlu0 %906 }
0x1620   :  { %v915_v42 = vadd.f32 %v951_v37, %v907_v41 }
0x1622   :  { %917 = vst.msk [vmem:[%s1375_s4] sm:$0x3] %vm916_vm3, %v915_v42 }

</bundles_post_ra>
